<compile_context>
chip_gen: v6e
topology: v6e:2x2x1
jax: 0.10.0
libtpu: 0.0.40
codegen_flags: <defaults>
</compile_context>

<pallas_src>
import jax
import jax.numpy as jnp
from jax.experimental import pallas as pl
from jax.experimental.pallas import tpu as pltpu


def _round_up(x, m):
    return (x + m - 1) // m * m


def dqn_kernel(x_ref, w1_ref, b1_ref, w2_ref, b2_ref, w3_ref, b3_ref, o_ref):
    # x_ref: (tb, in_size) f32; w*: bf16 (in, out); b*: f32 (1, out); o_ref: (tb, out_size) f32.
    x = x_ref[...].astype(jnp.bfloat16)
    h1 = jnp.dot(x, w1_ref[...], preferred_element_type=jnp.float32) + b1_ref[...]
    h1 = jnp.maximum(h1, 0.0).astype(jnp.bfloat16)
    h2 = jnp.dot(h1, w2_ref[...], preferred_element_type=jnp.float32) + b2_ref[...]
    h2 = jnp.maximum(h2, 0.0).astype(jnp.bfloat16)
    o_ref[...] = jnp.dot(h2, w3_ref[...], preferred_element_type=jnp.float32) + b3_ref[...]


def prepare_params(params):
    """One-time cast: weights -> bf16 (MXU operands), biases -> f32 (1, out)."""
    return (
        params["w1"].astype(jnp.bfloat16), params["b1"].astype(jnp.float32),
        params["w2"].astype(jnp.bfloat16), params["b2"].astype(jnp.float32),
        params["w3"].astype(jnp.bfloat16), params["b3"].astype(jnp.float32),
    )


def dqn_forward(x, prepared, *, tb=1024):
    """x: (B, input_size) f32. prepared: output of prepare_params. Returns (B, output_size) f32."""
    w1, b1, w2, b2, w3, b3 = prepared
    B, in_size = x.shape
    out_size = w3.shape[1]

    # Clamp the batch tile to the (8-aligned) batch size; grid handles any remainder tile.
    tb_eff = min(tb, _round_up(B, 8))
    grid = (pl.cdiv(B, tb_eff),)

    resident = lambda a: pl.BlockSpec(a.shape, lambda i: (0, 0))  # weights/biases stay in VMEM

    return pl.pallas_call(
        dqn_kernel,
        out_shape=jax.ShapeDtypeStruct((B, out_size), jnp.float32),
        grid=grid,
        in_specs=[
            pl.BlockSpec((tb_eff, in_size), lambda i: (i, 0)),   # stream batch rows of x (f32)
            resident(w1), resident(b1),
            resident(w2), resident(b2),
            resident(w3), resident(b3),
        ],
        out_specs=pl.BlockSpec((tb_eff, out_size), lambda i: (i, 0)),  # narrow, masked store
        compiler_params=pltpu.CompilerParams(dimension_semantics=("parallel",)),
    )(x, w1, b1, w2, b2, w3, b3)


def init_params(key, input_size, output_size):
    # Mimic PyTorch nn.Linear default init: U(-1/sqrt(fan_in), 1/sqrt(fan_in)).
    def linear(k, fan_in, fan_out):
        kw, kb = jax.random.split(k)
        bound = 1.0 / jnp.sqrt(jnp.float32(fan_in))
        w = jax.random.uniform(kw, (fan_in, fan_out), jnp.float32, -bound, bound)
        b = jax.random.uniform(kb, (1, fan_out), jnp.float32, -bound, bound)
        return w, b

    k1, k2, k3 = jax.random.split(key, 3)
    w1, b1 = linear(k1, input_size, 64)
    w2, b2 = linear(k2, 64, 32)
    w3, b3 = linear(k3, 32, output_size)
    return dict(w1=w1, b1=b1, w2=w2, b2=b2, w3=w3, b3=b3)


def dqn_reference(x, p):
    h1 = jnp.maximum(x @ p["w1"] + p["b1"], 0.0)
    h2 = jnp.maximum(h1 @ p["w2"] + p["b2"], 0.0)
    return h2 @ p["w3"] + p["b3"]


if __name__ == "__main__":
    key = jax.random.PRNGKey(0)
    k_param, k_x1, k_x2 = jax.random.split(key, 3)

    input_size, output_size = 16, 4
    params = init_params(k_param, input_size, output_size)
    prepared = prepare_params(params)  # hoisted out of the per-call path

    # 1) Tiny batch (single partial tile).
    x_small = jax.random.normal(k_x1, (8, input_size), jnp.float32)
    out_small = jax.block_until_ready(dqn_forward(x_small, prepared))
    ref_small = dqn_reference(x_small, params)
    assert out_small.shape == (8, output_size)
    assert jnp.allclose(out_small, ref_small, atol=2e-2, rtol=2e-2), "mismatch (B=8)"

    # 2) Non-multiple-of-8 batch (exercises the masked partial last tile).
    x_mid = jax.random.normal(k_x2, (300, input_size), jnp.float32)
    out_mid = jax.block_until_ready(dqn_forward(x_mid, prepared))
    ref_mid = dqn_reference(x_mid, params)
    assert out_mid.shape == (300, output_size)
    assert jnp.allclose(out_mid, ref_mid, atol=2e-2, rtol=2e-2), "mismatch (B=300)"

    # 3) Same data with a small tile to exercise the multi-step streaming grid path.
    out_multi = jax.block_until_ready(dqn_forward(x_mid, prepared, tb=128))
    assert out_multi.shape == (300, output_size)
    assert jnp.allclose(out_multi, ref_mid, atol=2e-2, rtol=2e-2), "mismatch (B=300, tb=128)"

    print("KERNEL_OK")
</pallas_src>

<mosaic_0001>
module attributes {stable_mosaic.version = 11 : i64} {
  func.func @dqn_kernel(%arg0: i32, %arg1: memref<8x16xf32, #tpu.memory_space<vmem>>, %arg2: memref<16x64xbf16, #tpu.memory_space<vmem>>, %arg3: memref<1x64xf32, #tpu.memory_space<vmem>>, %arg4: memref<64x32xbf16, #tpu.memory_space<vmem>>, %arg5: memref<1x32xf32, #tpu.memory_space<vmem>>, %arg6: memref<32x4xbf16, #tpu.memory_space<vmem>>, %arg7: memref<1x4xf32, #tpu.memory_space<vmem>>, %arg8: memref<8x4xf32, #tpu.memory_space<vmem>>) attributes {dimension_semantics = [#tpu.dimension_semantics<parallel>], iteration_bounds = array<i64: 1>, scalar_prefetch = 0 : i64, scratch_operands = 0 : i64, tpu.core_type = #tpu.core_type<tc>, window_params = [{transform_indices = @transform_0, window_bounds = array<i64: 8, 16>}, {pipeline_mode = #tpu.pipeline_mode<synchronous>, transform_indices = @transform_1, window_bounds = array<i64: 16, 64>}, {pipeline_mode = #tpu.pipeline_mode<synchronous>, transform_indices = @transform_2, window_bounds = array<i64: 1, 64>}, {pipeline_mode = #tpu.pipeline_mode<synchronous>, transform_indices = @transform_3, window_bounds = array<i64: 64, 32>}, {pipeline_mode = #tpu.pipeline_mode<synchronous>, transform_indices = @transform_4, window_bounds = array<i64: 1, 32>}, {pipeline_mode = #tpu.pipeline_mode<synchronous>, transform_indices = @transform_5, window_bounds = array<i64: 32, 4>}, {pipeline_mode = #tpu.pipeline_mode<synchronous>, transform_indices = @transform_6, window_bounds = array<i64: 1, 4>}, {transform_indices = @transform_7, window_bounds = array<i64: 8, 4>}]} {
    %c0 = arith.constant 0 : index
    %c0_0 = arith.constant 0 : index
    %0 = vector.load %arg1[%c0, %c0_0] : memref<8x16xf32, #tpu.memory_space<vmem>>, vector<8x16xf32>
    %1 = arith.truncf %0 : vector<8x16xf32> to vector<8x16xbf16>
    %c0_1 = arith.constant 0 : index
    %c0_2 = arith.constant 0 : index
    %2 = vector.load %arg2[%c0_1, %c0_2] : memref<16x64xbf16, #tpu.memory_space<vmem>>, vector<16x64xbf16>
    %cst = arith.constant dense<0.000000e+00> : vector<8x64xf32>
    %3 = tpu.matmul %1, %2, %cst {dimension_numbers = #tpu.dot_dimension_numbers<[1], [0], [0], [1], [0, 0, 1, 1], [], []>} : vector<8x16xbf16>, vector<16x64xbf16>, vector<8x64xf32> -> vector<8x64xf32>
    %c0_3 = arith.constant 0 : index
    %c0_4 = arith.constant 0 : index
    %4 = vector.load %arg3[%c0_3, %c0_4] : memref<1x64xf32, #tpu.memory_space<vmem>>, vector<1x64xf32>
    %5 = vector.broadcast %4 : vector<1x64xf32> to vector<8x64xf32>
    %6 = arith.addf %3, %5 : vector<8x64xf32>
    %cst_5 = arith.constant 0.000000e+00 : f32
    %7 = vector.broadcast %cst_5 : f32 to vector<8x64xf32>
    %8 = arith.maximumf %6, %7 : vector<8x64xf32>
    %9 = arith.truncf %8 : vector<8x64xf32> to vector<8x64xbf16>
    %c0_6 = arith.constant 0 : index
    %c0_7 = arith.constant 0 : index
    %10 = vector.load %arg4[%c0_6, %c0_7] : memref<64x32xbf16, #tpu.memory_space<vmem>>, vector<64x32xbf16>
    %cst_8 = arith.constant dense<0.000000e+00> : vector<8x32xf32>
    %11 = tpu.matmul %9, %10, %cst_8 {dimension_numbers = #tpu.dot_dimension_numbers<[1], [0], [0], [1], [0, 0, 1, 1], [], []>} : vector<8x64xbf16>, vector<64x32xbf16>, vector<8x32xf32> -> vector<8x32xf32>
    %c0_9 = arith.constant 0 : index
    %c0_10 = arith.constant 0 : index
    %12 = vector.load %arg5[%c0_9, %c0_10] : memref<1x32xf32, #tpu.memory_space<vmem>>, vector<1x32xf32>
    %13 = vector.broadcast %12 : vector<1x32xf32> to vector<8x32xf32>
    %14 = arith.addf %11, %13 : vector<8x32xf32>
    %cst_11 = arith.constant 0.000000e+00 : f32
    %15 = vector.broadcast %cst_11 : f32 to vector<8x32xf32>
    %16 = arith.maximumf %14, %15 : vector<8x32xf32>
    %17 = arith.truncf %16 : vector<8x32xf32> to vector<8x32xbf16>
    %c0_12 = arith.constant 0 : index
    %c0_13 = arith.constant 0 : index
    %18 = vector.load %arg6[%c0_12, %c0_13] : memref<32x4xbf16, #tpu.memory_space<vmem>>, vector<32x4xbf16>
    %cst_14 = arith.constant dense<0.000000e+00> : vector<8x4xf32>
    %19 = tpu.matmul %17, %18, %cst_14 {dimension_numbers = #tpu.dot_dimension_numbers<[1], [0], [0], [1], [0, 0, 1, 1], [], []>} : vector<8x32xbf16>, vector<32x4xbf16>, vector<8x4xf32> -> vector<8x4xf32>
    %c0_15 = arith.constant 0 : index
    %c0_16 = arith.constant 0 : index
    %20 = vector.load %arg7[%c0_15, %c0_16] : memref<1x4xf32, #tpu.memory_space<vmem>>, vector<1x4xf32>
    %21 = vector.broadcast %20 : vector<1x4xf32> to vector<8x4xf32>
    %22 = arith.addf %19, %21 : vector<8x4xf32>
    %c0_17 = arith.constant 0 : index
    %c0_18 = arith.constant 0 : index
    %23 = vector.load %arg8[%c0_17, %c0_18] : memref<8x4xf32, #tpu.memory_space<vmem>>, vector<8x4xf32>
    tpu.vector_store %arg8[%c0_17, %c0_18], %22 {strides = array<i32>} : memref<8x4xf32, #tpu.memory_space<vmem>>, vector<8x4xf32>,
    return
  }
  func.func @transform_0(%arg0: i32) -> (i32, i32) {
    %c0_i32 = arith.constant 0 : i32
    %c0_i32_0 = arith.constant 0 : i32
    return %arg0, %c0_i32 : i32, i32
  }
  func.func @transform_1(%arg0: i32) -> (i32, i32) {
    %c0_i32 = arith.constant 0 : i32
    %c0_i32_0 = arith.constant 0 : i32
    %c0_i32_1 = arith.constant 0 : i32
    return %c0_i32, %c0_i32_0 : i32, i32
  }
  func.func @transform_2(%arg0: i32) -> (i32, i32) {
    %c0_i32 = arith.constant 0 : i32
    %c0_i32_0 = arith.constant 0 : i32
    %c0_i32_1 = arith.constant 0 : i32
    return %c0_i32, %c0_i32_0 : i32, i32
  }
  func.func @transform_3(%arg0: i32) -> (i32, i32) {
    %c0_i32 = arith.constant 0 : i32
    %c0_i32_0 = arith.constant 0 : i32
    %c0_i32_1 = arith.constant 0 : i32
    return %c0_i32, %c0_i32_0 : i32, i32
  }
  func.func @transform_4(%arg0: i32) -> (i32, i32) {
    %c0_i32 = arith.constant 0 : i32
    %c0_i32_0 = arith.constant 0 : i32
    %c0_i32_1 = arith.constant 0 : i32
    return %c0_i32, %c0_i32_0 : i32, i32
  }
  func.func @transform_5(%arg0: i32) -> (i32, i32) {
    %c0_i32 = arith.constant 0 : i32
    %c0_i32_0 = arith.constant 0 : i32
    %c0_i32_1 = arith.constant 0 : i32
    return %c0_i32, %c0_i32_0 : i32, i32
  }
  func.func @transform_6(%arg0: i32) -> (i32, i32) {
    %c0_i32 = arith.constant 0 : i32
    %c0_i32_0 = arith.constant 0 : i32
    %c0_i32_1 = arith.constant 0 : i32
    return %c0_i32, %c0_i32_0 : i32, i32
  }
  func.func @transform_7(%arg0: i32) -> (i32, i32) {
    %c0_i32 = arith.constant 0 : i32
    %c0_i32_0 = arith.constant 0 : i32
    return %arg0, %c0_i32 : i32, i32
  }
}

</mosaic_0001>

<bundles_post_ra>
// kernel: tpu_custom_call.1
= control target key start
LH: loop header
LB: loop body
LE: loop exit
PB: predicated region body
PF: predicated region fallthrough
CT: control target
= control target key end

     0   :  { %v306_v0 = vmov 0.0   ;;  %vm307_vm0 = vmmov 0   ;;  %vm44_vm1 = vcmask 130048   ;;  %vm129_vm2 = vcmask 523264   ;;  %s384_s1 = inlined_call_operand.vmem [shape: bf16[16,64], index: 1, kind: input, shape index: {}]   ;;  %s385_s0 = inlined_call_operand.vmem [shape: f32[8,16], index: 0, kind: input, shape index: {}]   ;;  %s386_s3 = inlined_call_operand.vmem [shape: bf16[64,32], index: 3, kind: input, shape index: {}]   ;;  %s387_s5 = inlined_call_operand.vmem [shape: bf16[32,4], index: 5, kind: input, shape index: {}]   ;;  %s388_s2 = inlined_call_operand.vmem [shape: f32[1,64], index: 2, kind: input, shape index: {}]   ;;  %s389_s4 = inlined_call_operand.vmem [shape: f32[1,32], index: 4, kind: input, shape index: {}]   ;;  %s390_s6 = inlined_call_operand.vmem [shape: f32[1,4], index: 6, kind: input, shape index: {}]   ;;  %s391_s7 = inlined_call_operand.vmem [shape: f32[8,4], index: 7, kind: output, shape index: {}]  }
   0x1   :  { %271 = vmatprep.subr.bf16.mxu0 %v306_v0  ;;  %v299_v1 = vld [vmem:[%s384_s1] sm:$0xff]   ;;  %273 = vmatprep.mubr.msk.bf16.mxu0 %vm307_vm0, %v306_v0  ;;  %v300_v4 = vld [vmem:[%s386_s3 + $0x18] sm:$0xff]   ;;  %v301_v5 = vld [vmem:[%s386_s3 + $0x10] sm:$0xff]   ;;  %vm198_vm3 = vcmask 261120   ;;  %vm242_vm4 = vcmask 31744  }
   0x2   :  { %v27_v2 = vld [vmem:[%s385_s0] sm:$0xff]  ;;  %277 = vmatprep.subr.bf16.mxu1 %v306_v0  ;;  %285 = vmatprep.mubr.msk.bf16.mxu1 %vm307_vm0, %v306_v0  ;;  %v302_v6 = vld [vmem:[%s386_s3 + $0x8] sm:$0xff]  }
   0x3   :  { %272 = vmatpush3.bf16.msra.mxu0 %v299_v1  ;;  %v28_v3 = vpack.c.bf16 %v27_v2, %v27_v2  ;;  %278 = vmatpush3.bf16.msra.mxu1 %v300_v4  ;;  %v303_v7 = vld [vmem:[%s386_s3] sm:$0xff]   ;;  %v304_v8 = vld [vmem:[%s387_s5 + $0x8] sm:$0xff]  }
   0x4   :  { %289 = vmatprep.subr.bf16.mxu0 %v306_v0  ;;  %279 = vmatprep.subr.bf16.mxu1 %v306_v0  ;;  %v248_v9 = vld [vmem:[%s388_s2] ss:$0 sm:$0xff] }
   0x5   :  { %v305_v17 = vld [vmem:[%s387_s5] sm:$0xff]  }
   0x6   :  { %274 = vmatmul.mubr.msk.bf16.vlgmr.msra.gmra.mxu0 %vm44_vm1, %v28_v3  ;;  %v251_v18 = vld [vmem:[%s389_s4] ss:$0 sm:$0xff] }
   0x7   :  { %293 = vmatprep.mubr.msk.bf16.mxu0 %vm307_vm0, %v306_v0  ;;  %280 = vmatpush3.bf16.msra.mxu1 %v301_v5  ;;  %v257_v26 = vld [vmem:[%s390_s6] ss:$0 sm:$0xff] }
   0x8   :  { %281 = vmatprep.subr.bf16.mxu1 %v306_v0  ;;  %290 = vmatpush3.bf16.msra.mxu0 %v304_v8 }
   0x9   :  { %291 = vmatprep.subr.bf16.mxu0 %v306_v0 }
   0xb   :  { %282 = vmatpush3.bf16.msra.mxu1 %v302_v6 }
   0xc   :  { %283 = vmatprep.subr.bf16.mxu1 %v306_v0  ;;  %292 = vmatpush3.bf16.msra.mxu0 %v305_v17 }
   0xf   :  { %284 = vmatpush3.bf16.msra.mxu1 %v303_v7 }
  0xc6   :  { %v82_v10 = vpop.f32.mrf.mxu0 }
  0xc7   :  { %v83_v11 = vadd.f32 %v248_v9, %v82_v10 }
  0xc8   :  { %v275_v12 = vpop.f32.mrf.mxu0 }
  0xc9   :  { %v88_v13 = vmax.f32 %v83_v11, 0.0 }
  0xca   :  { %v85_v14 = vpop.f32.mrf.mxu0 }
  0xcb   :  { %v89_v15 = vpack.c.bf16 %v88_v13, %v88_v13 }
  0xcc   :  { %v276_v16 = vpop.f32.mrf.mxu0 }
  0xcd   :  { %286 = vmatmul.mubr.msk.bf16.vlgmr.msra.gmra.mxu1 %vm129_vm2, %v89_v15 }
 0x18d   :  { %v167_v19 = vpop.f32.mrf.mxu1 }
 0x18e   :  { %v168_v20 = vadd.f32 %v251_v18, %v167_v19 }
 0x18f   :  { %v287_v21 = vpop.f32.mrf.mxu1 }
 0x190   :  { %v173_v22 = vmax.f32 %v168_v20, 0.0 }
 0x191   :  { %v170_v23 = vpop.f32.mrf.mxu1 }
 0x192   :  { %v174_v24 = vpack.c.bf16 %v173_v22, %v173_v22 }
 0x193   :  { %v288_v25 = vpop.f32.mrf.mxu1 }
 0x194   :  { %294 = vmatmul.mubr.msk.bf16.vlgmr.msra.gmra.mxu0 %vm198_vm3, %v174_v24 }
 0x254   :  { %v236_v27 = vpop.f32.mrf.mxu0 }
 0x255   :  { %v237_v28 = vadd.f32 %v257_v26, %v236_v27 }
 0x256   :  { %v295_v29 = vpop.f32.mrf.mxu0 }
 0x257   :  { %243 = vst.msk [vmem:[%s391_s7] sm:$0xff] %vm242_vm4, %v237_v28 }
 0x258   :  { %v239_v30 = vpop.f32.mrf.mxu0 }
 0x25a   :  { %v296_v31 = vpop.f32.mrf.mxu0 }

</bundles_post_ra>
